<compile_context>
chip_gen: v7x
topology: tpu7x:2x2x1
jax: 0.10.0
libtpu: 0.0.40
codegen_flags: <defaults>
</compile_context>

<pallas_src>
import functools

import jax
import jax.numpy as jnp
import numpy as np
from jax.experimental import pallas as pl
from jax.experimental.pallas import tpu as pltpu


def _round_up(v: int, m: int) -> int:
    return (v + m - 1) // m * m


def _downsample_kernel(x0, x1, x2, w_ref, b_ref, o_ref):
    """One (n, to) grid step: full 3x3x3 stride-2 conv for one output T-plane.

    x0/x1/x2: (Hh, Wh, 4C)   padded T-planes 2*to+kt (kt=0,1,2); lane dim holds
                             (h_parity, w_parity, cin).
    w_ref:    (48C, Coutp)   packed weights; row blocks of 4C ordered
                             (kt, oh, ow) with inner (hp, wp, cin).
    b_ref:    (1, Coutp)     bias (f32).
    o_ref:    (Ho*Wo, Coutp) channels-last output tile.
    """
    hh, wh, c4 = x0.shape
    ho, wo = hh - 1, wh - 1
    xs = (x0, x1, x2)

    # Row-chunk (M tile) so the f32 accumulator chunk stays register-resident.
    hc = min(ho, max(1, 1024 // wo))
    while ho % hc:
        hc -= 1

    for h0 in range(0, ho, hc):
        acc = None
        i = 0
        for kt in range(3):                 # folded kt reduction (no carry)
            for oh in range(2):             # tap group = (kh//2, kw//2)
                for ow in range(2):
                    lhs = xs[kt][oh + h0:oh + h0 + hc, ow:ow + wo, :]
                    lhs = lhs.reshape(hc * wo, c4)
                    part = jnp.dot(lhs, w_ref[i * c4:(i + 1) * c4, :],
                                   preferred_element_type=jnp.float32)
                    acc = part if acc is None else acc + part
                    i += 1
        o_ref[h0 * wo:(h0 + hc) * wo, :] = (acc + b_ref[...]).astype(o_ref.dtype)


def downsample_forward(x, weight, bias, time_emb=None, y=None, *,
                       compute_dtype=jnp.bfloat16):
    """Equivalent of Downsample.forward(x, time_emb, y); time_emb/y ignored."""
    del time_emb, y
    N, C, T, H, W = x.shape
    if T % 2 or H % 2 or W % 2:
        raise ValueError("T, H, W must all be even")
    Cout = weight.shape[0]
    To, Ho, Wo = T // 2, H // 2, W // 2
    Tp = T + 2
    Hh, Wh = Ho + 1, Wo + 1

    # Lane-pad Cout only while write amplification stays <= 4x; otherwise use
    # masked stores with the true Cout (avoids 32x padded writeback at Cout=4).
    Coutp = _round_up(Cout, 128)
    if Coutp > 4 * Cout:
        Coutp = Cout

    # ---- wrapper glue (~1x input traffic) ----------------------------------
    xt = jnp.transpose(x, (0, 2, 3, 4, 1)).astype(compute_dtype)     # (N,T,H,W,C)
    xp = jnp.pad(xt, ((0, 0), (1, 1), (1, 1), (1, 1), (0, 0)))       # (N,Tp,Hp,Wp,C)
    # single merged array; lane dim = (h_parity, w_parity, cin) -> 4C
    xq = xp.reshape(N, Tp, Hh, 2, Wh, 2, C)
    xq = jnp.transpose(xq, (0, 1, 2, 4, 3, 5, 6)).reshape(N, Tp, Hh, Wh, 4 * C)

    # weights: (Cout,Cin,3,3,3) -> row blocks (kt, oh, ow) x (hp, wp, cin).
    # kh = 2*oh + hp, kw = 2*ow + wp; the padded kh=3 / kw=3 rows are zero.
    wt = jnp.transpose(weight, (2, 3, 4, 1, 0))                      # (kt,kh,kw,Ci,Co)
    wt = jnp.pad(wt, ((0, 0), (0, 1), (0, 1), (0, 0), (0, Coutp - Cout)))
    wt = wt.reshape(3, 2, 2, 2, 2, C, Coutp).transpose(0, 1, 3, 2, 4, 5, 6)
    wt = wt.astype(compute_dtype).reshape(48 * C, Coutp)
    b2 = jnp.pad(bias.astype(jnp.float32), ((0, Coutp - Cout),)).reshape(1, Coutp)

    def x_spec(kt):
        return pl.BlockSpec((None, None, Hh, Wh, 4 * C),
                            lambda n, to, _kt=kt: (n, 2 * to + _kt, 0, 0, 0))

    # constant block index -> the weight/bias blocks are DMA'd exactly once.
    w_spec = pl.BlockSpec((48 * C, Coutp), lambda n, to: (0, 0))
    b_spec = pl.BlockSpec((1, Coutp), lambda n, to: (0, 0))
    o_spec = pl.BlockSpec((None, None, Ho * Wo, Coutp), lambda n, to: (n, to, 0, 0))

    comp_isz = int(np.dtype(compute_dtype).itemsize)
    out_isz = int(np.dtype(x.dtype).itemsize)
    M = N * To * Ho * Wo
    cost = pl.CostEstimate(
        flops=int(2 * M * 27 * C * Cout),
        transcendentals=0,
        bytes_accessed=int(3 * N * To * Hh * Wh * 4 * C * comp_isz
                           + 48 * C * Coutp * comp_isz
                           + M * Coutp * out_isz))

    # generation-safe VMEM budget derived from actual buffer sizes
    plane = Hh * Wh * 4 * C * comp_isz
    need = (3 * 2 * plane                              # 3 plane specs, double-buffered
            + 2 * 48 * C * Coutp * comp_isz            # weights
            + 2 * Ho * Wo * Coutp * out_isz            # output block, double-buffered
            + Ho * Wo * max(Coutp, 128) * 4            # f32 accumulator headroom
            + Ho * Wo * 4 * C * comp_isz)              # packed lhs chunk
    vmem_limit = int(min(48 * 2 ** 20, max(4 * 2 ** 20, 2 * need)))

    out_cl = pl.pallas_call(
        _downsample_kernel,
        out_shape=jax.ShapeDtypeStruct((N, To, Ho * Wo, Coutp), x.dtype),
        grid_spec=pltpu.PrefetchScalarGridSpec(
            num_scalar_prefetch=0,
            grid=(N, To),
            in_specs=[x_spec(0), x_spec(1), x_spec(2), w_spec, b_spec],
            out_specs=o_spec),
        compiler_params=pltpu.CompilerParams(
            dimension_semantics=("parallel", "parallel"),
            vmem_limit_bytes=vmem_limit),
        cost_estimate=cost,
    )(xq, xq, xq, wt, b2)

    out = out_cl[..., :Cout].reshape(N, To, Ho, Wo, Cout)
    return jnp.transpose(out, (0, 4, 1, 2, 3))         # back to NCDHW


if __name__ == "__main__":
    key = jax.random.PRNGKey(0)
    kx, kw_, kb = jax.random.split(key, 3)

    Nb, Cin, T, H, W = 2, 4, 8, 16, 16
    x = jax.random.normal(kx, (Nb, Cin, T, H, W), dtype=jnp.float32)

    # deterministic synthetic parameters (Conv3d(in_channels, in_channels, 3))
    weight = jax.random.normal(kw_, (Cin, Cin, 3, 3, 3), dtype=jnp.float32) * 0.05
    bias = jax.random.normal(kb, (Cin,), dtype=jnp.float32) * 0.05

    fwd = jax.jit(lambda a, w, b: downsample_forward(a, w, b))
    out = jax.block_until_ready(fwd(x, weight, bias))

    assert out.shape == (Nb, Cin, T // 2, H // 2, W // 2), out.shape

    # reference check with XLA conv (same semantics as torch Conv3d stride=2 pad=1)
    ref = jax.lax.conv_general_dilated(
        x, weight, window_strides=(2, 2, 2),
        padding=((1, 1), (1, 1), (1, 1)),
        dimension_numbers=("NCDHW", "OIDHW", "NCDHW"),
    ) + bias.reshape(1, -1, 1, 1, 1)
    # bf16 MXU inputs with f32 accumulation -> slightly looser tolerance.
    assert jnp.allclose(out, ref, atol=2e-2, rtol=2e-2), "mismatch vs reference"

    print("KERNEL_OK")
</pallas_src>

<mosaic_0001>
module attributes {stable_mosaic.version = 11 : i64} {
  func.func @_downsample_kernel(%arg0: i32, %arg1: i32, %arg2: memref<1x1x9x9x16xbf16, #tpu.memory_space<vmem>>, %arg3: memref<1x1x9x9x16xbf16, #tpu.memory_space<vmem>>, %arg4: memref<1x1x9x9x16xbf16, #tpu.memory_space<vmem>>, %arg5: memref<192x4xbf16, #tpu.memory_space<vmem>>, %arg6: memref<1x4xf32, #tpu.memory_space<vmem>>, %arg7: memref<1x1x64x4xf32, #tpu.memory_space<vmem>>) attributes {dimension_semantics = [#tpu.dimension_semantics<parallel>, #tpu.dimension_semantics<parallel>], iteration_bounds = array<i64: 2, 4>, scalar_prefetch = 0 : i64, scratch_operands = 0 : i64, tpu.core_type = #tpu.core_type<tc>, window_params = [{transform_indices = @transform_0, window_bounds = array<i64: 1, 1, 9, 9, 16>}, {transform_indices = @transform_1, window_bounds = array<i64: 1, 1, 9, 9, 16>}, {transform_indices = @transform_2, window_bounds = array<i64: 1, 1, 9, 9, 16>}, {pipeline_mode = #tpu.pipeline_mode<synchronous>, transform_indices = @transform_3, window_bounds = array<i64: 192, 4>}, {pipeline_mode = #tpu.pipeline_mode<synchronous>, transform_indices = @transform_4, window_bounds = array<i64: 1, 4>}, {transform_indices = @transform_5, window_bounds = array<i64: 1, 1, 64, 4>}]} {
    %c0 = arith.constant 0 : index
    %c0_0 = arith.constant 0 : index
    %c0_1 = arith.constant 0 : index
    %c0_2 = arith.constant 0 : index
    %c0_3 = arith.constant 0 : index
    %0 = vector.load %arg2[%c0, %c0_0, %c0_1, %c0_2, %c0_3] : memref<1x1x9x9x16xbf16, #tpu.memory_space<vmem>>, vector<1x1x8x8x16xbf16>
    %1 = vector.shape_cast %0 : vector<1x1x8x8x16xbf16> to vector<8x8x16xbf16>
    %2 = vector.shape_cast %1 : vector<8x8x16xbf16> to vector<64x16xbf16>
    %c0_4 = arith.constant 0 : index
    %c0_5 = arith.constant 0 : index
    %3 = vector.load %arg5[%c0_4, %c0_5] : memref<192x4xbf16, #tpu.memory_space<vmem>>, vector<16x4xbf16>
    %cst = arith.constant dense<0.000000e+00> : vector<64x4xf32>
    %4 = tpu.matmul %2, %3, %cst {dimension_numbers = #tpu.dot_dimension_numbers<[1], [0], [0], [1], [0, 0, 1, 1], [], []>} : vector<64x16xbf16>, vector<16x4xbf16>, vector<64x4xf32> -> vector<64x4xf32>
    %c0_6 = arith.constant 0 : index
    %c0_7 = arith.constant 0 : index
    %c0_8 = arith.constant 0 : index
    %c1 = arith.constant 1 : index
    %c0_9 = arith.constant 0 : index
    %5 = vector.load %arg2[%c0_6, %c0_7, %c0_8, %c1, %c0_9] : memref<1x1x9x9x16xbf16, #tpu.memory_space<vmem>>, vector<1x1x8x8x16xbf16>
    %6 = vector.shape_cast %5 : vector<1x1x8x8x16xbf16> to vector<8x8x16xbf16>
    %7 = vector.shape_cast %6 : vector<8x8x16xbf16> to vector<64x16xbf16>
    %c16 = arith.constant 16 : index
    %c0_10 = arith.constant 0 : index
    %8 = vector.load %arg5[%c16, %c0_10] : memref<192x4xbf16, #tpu.memory_space<vmem>>, vector<16x4xbf16>
    %cst_11 = arith.constant dense<0.000000e+00> : vector<64x4xf32>
    %9 = tpu.matmul %7, %8, %cst_11 {dimension_numbers = #tpu.dot_dimension_numbers<[1], [0], [0], [1], [0, 0, 1, 1], [], []>} : vector<64x16xbf16>, vector<16x4xbf16>, vector<64x4xf32> -> vector<64x4xf32>
    %10 = arith.addf %4, %9 : vector<64x4xf32>
    %c0_12 = arith.constant 0 : index
    %c0_13 = arith.constant 0 : index
    %c1_14 = arith.constant 1 : index
    %c0_15 = arith.constant 0 : index
    %c0_16 = arith.constant 0 : index
    %11 = vector.load %arg2[%c0_12, %c0_13, %c1_14, %c0_15, %c0_16] : memref<1x1x9x9x16xbf16, #tpu.memory_space<vmem>>, vector<1x1x8x8x16xbf16>
    %12 = vector.shape_cast %11 : vector<1x1x8x8x16xbf16> to vector<8x8x16xbf16>
    %13 = vector.shape_cast %12 : vector<8x8x16xbf16> to vector<64x16xbf16>
    %c32 = arith.constant 32 : index
    %c0_17 = arith.constant 0 : index
    %14 = vector.load %arg5[%c32, %c0_17] : memref<192x4xbf16, #tpu.memory_space<vmem>>, vector<16x4xbf16>
    %cst_18 = arith.constant dense<0.000000e+00> : vector<64x4xf32>
    %15 = tpu.matmul %13, %14, %cst_18 {dimension_numbers = #tpu.dot_dimension_numbers<[1], [0], [0], [1], [0, 0, 1, 1], [], []>} : vector<64x16xbf16>, vector<16x4xbf16>, vector<64x4xf32> -> vector<64x4xf32>
    %16 = arith.addf %10, %15 : vector<64x4xf32>
    %c0_19 = arith.constant 0 : index
    %c0_20 = arith.constant 0 : index
    %c1_21 = arith.constant 1 : index
    %c1_22 = arith.constant 1 : index
    %c0_23 = arith.constant 0 : index
    %17 = vector.load %arg2[%c0_19, %c0_20, %c1_21, %c1_22, %c0_23] : memref<1x1x9x9x16xbf16, #tpu.memory_space<vmem>>, vector<1x1x8x8x16xbf16>
    %18 = vector.shape_cast %17 : vector<1x1x8x8x16xbf16> to vector<8x8x16xbf16>
    %19 = vector.shape_cast %18 : vector<8x8x16xbf16> to vector<64x16xbf16>
    %c48 = arith.constant 48 : index
    %c0_24 = arith.constant 0 : index
    %20 = vector.load %arg5[%c48, %c0_24] : memref<192x4xbf16, #tpu.memory_space<vmem>>, vector<16x4xbf16>
    %cst_25 = arith.constant dense<0.000000e+00> : vector<64x4xf32>
    %21 = tpu.matmul %19, %20, %cst_25 {dimension_numbers = #tpu.dot_dimension_numbers<[1], [0], [0], [1], [0, 0, 1, 1], [], []>} : vector<64x16xbf16>, vector<16x4xbf16>, vector<64x4xf32> -> vector<64x4xf32>
    %22 = arith.addf %16, %21 : vector<64x4xf32>
    %c0_26 = arith.constant 0 : index
    %c0_27 = arith.constant 0 : index
    %c0_28 = arith.constant 0 : index
    %c0_29 = arith.constant 0 : index
    %c0_30 = arith.constant 0 : index
    %23 = vector.load %arg3[%c0_26, %c0_27, %c0_28, %c0_29, %c0_30] : memref<1x1x9x9x16xbf16, #tpu.memory_space<vmem>>, vector<1x1x8x8x16xbf16>
    %24 = vector.shape_cast %23 : vector<1x1x8x8x16xbf16> to vector<8x8x16xbf16>
    %25 = vector.shape_cast %24 : vector<8x8x16xbf16> to vector<64x16xbf16>
    %c64 = arith.constant 64 : index
    %c0_31 = arith.constant 0 : index
    %26 = vector.load %arg5[%c64, %c0_31] : memref<192x4xbf16, #tpu.memory_space<vmem>>, vector<16x4xbf16>
    %cst_32 = arith.constant dense<0.000000e+00> : vector<64x4xf32>
    %27 = tpu.matmul %25, %26, %cst_32 {dimension_numbers = #tpu.dot_dimension_numbers<[1], [0], [0], [1], [0, 0, 1, 1], [], []>} : vector<64x16xbf16>, vector<16x4xbf16>, vector<64x4xf32> -> vector<64x4xf32>
    %28 = arith.addf %22, %27 : vector<64x4xf32>
    %c0_33 = arith.constant 0 : index
    %c0_34 = arith.constant 0 : index
    %c0_35 = arith.constant 0 : index
    %c1_36 = arith.constant 1 : index
    %c0_37 = arith.constant 0 : index
    %29 = vector.load %arg3[%c0_33, %c0_34, %c0_35, %c1_36, %c0_37] : memref<1x1x9x9x16xbf16, #tpu.memory_space<vmem>>, vector<1x1x8x8x16xbf16>
    %30 = vector.shape_cast %29 : vector<1x1x8x8x16xbf16> to vector<8x8x16xbf16>
    %31 = vector.shape_cast %30 : vector<8x8x16xbf16> to vector<64x16xbf16>
    %c80 = arith.constant 80 : index
    %c0_38 = arith.constant 0 : index
    %32 = vector.load %arg5[%c80, %c0_38] : memref<192x4xbf16, #tpu.memory_space<vmem>>, vector<16x4xbf16>
    %cst_39 = arith.constant dense<0.000000e+00> : vector<64x4xf32>
    %33 = tpu.matmul %31, %32, %cst_39 {dimension_numbers = #tpu.dot_dimension_numbers<[1], [0], [0], [1], [0, 0, 1, 1], [], []>} : vector<64x16xbf16>, vector<16x4xbf16>, vector<64x4xf32> -> vector<64x4xf32>
    %34 = arith.addf %28, %33 : vector<64x4xf32>
    %c0_40 = arith.constant 0 : index
    %c0_41 = arith.constant 0 : index
    %c1_42 = arith.constant 1 : index
    %c0_43 = arith.constant 0 : index
    %c0_44 = arith.constant 0 : index
    %35 = vector.load %arg3[%c0_40, %c0_41, %c1_42, %c0_43, %c0_44] : memref<1x1x9x9x16xbf16, #tpu.memory_space<vmem>>, vector<1x1x8x8x16xbf16>
    %36 = vector.shape_cast %35 : vector<1x1x8x8x16xbf16> to vector<8x8x16xbf16>
    %37 = vector.shape_cast %36 : vector<8x8x16xbf16> to vector<64x16xbf16>
    %c96 = arith.constant 96 : index
    %c0_45 = arith.constant 0 : index
    %38 = vector.load %arg5[%c96, %c0_45] : memref<192x4xbf16, #tpu.memory_space<vmem>>, vector<16x4xbf16>
    %cst_46 = arith.constant dense<0.000000e+00> : vector<64x4xf32>
    %39 = tpu.matmul %37, %38, %cst_46 {dimension_numbers = #tpu.dot_dimension_numbers<[1], [0], [0], [1], [0, 0, 1, 1], [], []>} : vector<64x16xbf16>, vector<16x4xbf16>, vector<64x4xf32> -> vector<64x4xf32>
    %40 = arith.addf %34, %39 : vector<64x4xf32>
    %c0_47 = arith.constant 0 : index
    %c0_48 = arith.constant 0 : index
    %c1_49 = arith.constant 1 : index
    %c1_50 = arith.constant 1 : index
    %c0_51 = arith.constant 0 : index
    %41 = vector.load %arg3[%c0_47, %c0_48, %c1_49, %c1_50, %c0_51] : memref<1x1x9x9x16xbf16, #tpu.memory_space<vmem>>, vector<1x1x8x8x16xbf16>
    %42 = vector.shape_cast %41 : vector<1x1x8x8x16xbf16> to vector<8x8x16xbf16>
    %43 = vector.shape_cast %42 : vector<8x8x16xbf16> to vector<64x16xbf16>
    %c112 = arith.constant 112 : index
    %c0_52 = arith.constant 0 : index
    %44 = vector.load %arg5[%c112, %c0_52] : memref<192x4xbf16, #tpu.memory_space<vmem>>, vector<16x4xbf16>
    %cst_53 = arith.constant dense<0.000000e+00> : vector<64x4xf32>
    %45 = tpu.matmul %43, %44, %cst_53 {dimension_numbers = #tpu.dot_dimension_numbers<[1], [0], [0], [1], [0, 0, 1, 1], [], []>} : vector<64x16xbf16>, vector<16x4xbf16>, vector<64x4xf32> -> vector<64x4xf32>
    %46 = arith.addf %40, %45 : vector<64x4xf32>
    %c0_54 = arith.constant 0 : index
    %c0_55 = arith.constant 0 : index
    %c0_56 = arith.constant 0 : index
    %c0_57 = arith.constant 0 : index
    %c0_58 = arith.constant 0 : index
    %47 = vector.load %arg4[%c0_54, %c0_55, %c0_56, %c0_57, %c0_58] : memref<1x1x9x9x16xbf16, #tpu.memory_space<vmem>>, vector<1x1x8x8x16xbf16>
    %48 = vector.shape_cast %47 : vector<1x1x8x8x16xbf16> to vector<8x8x16xbf16>
    %49 = vector.shape_cast %48 : vector<8x8x16xbf16> to vector<64x16xbf16>
    %c128 = arith.constant 128 : index
    %c0_59 = arith.constant 0 : index
    %50 = vector.load %arg5[%c128, %c0_59] : memref<192x4xbf16, #tpu.memory_space<vmem>>, vector<16x4xbf16>
    %cst_60 = arith.constant dense<0.000000e+00> : vector<64x4xf32>
    %51 = tpu.matmul %49, %50, %cst_60 {dimension_numbers = #tpu.dot_dimension_numbers<[1], [0], [0], [1], [0, 0, 1, 1], [], []>} : vector<64x16xbf16>, vector<16x4xbf16>, vector<64x4xf32> -> vector<64x4xf32>
    %52 = arith.addf %46, %51 : vector<64x4xf32>
    %c0_61 = arith.constant 0 : index
    %c0_62 = arith.constant 0 : index
    %c0_63 = arith.constant 0 : index
    %c1_64 = arith.constant 1 : index
    %c0_65 = arith.constant 0 : index
    %53 = vector.load %arg4[%c0_61, %c0_62, %c0_63, %c1_64, %c0_65] : memref<1x1x9x9x16xbf16, #tpu.memory_space<vmem>>, vector<1x1x8x8x16xbf16>
    %54 = vector.shape_cast %53 : vector<1x1x8x8x16xbf16> to vector<8x8x16xbf16>
    %55 = vector.shape_cast %54 : vector<8x8x16xbf16> to vector<64x16xbf16>
    %c144 = arith.constant 144 : index
    %c0_66 = arith.constant 0 : index
    %56 = vector.load %arg5[%c144, %c0_66] : memref<192x4xbf16, #tpu.memory_space<vmem>>, vector<16x4xbf16>
    %cst_67 = arith.constant dense<0.000000e+00> : vector<64x4xf32>
    %57 = tpu.matmul %55, %56, %cst_67 {dimension_numbers = #tpu.dot_dimension_numbers<[1], [0], [0], [1], [0, 0, 1, 1], [], []>} : vector<64x16xbf16>, vector<16x4xbf16>, vector<64x4xf32> -> vector<64x4xf32>
    %58 = arith.addf %52, %57 : vector<64x4xf32>
    %c0_68 = arith.constant 0 : index
    %c0_69 = arith.constant 0 : index
    %c1_70 = arith.constant 1 : index
    %c0_71 = arith.constant 0 : index
    %c0_72 = arith.constant 0 : index
    %59 = vector.load %arg4[%c0_68, %c0_69, %c1_70, %c0_71, %c0_72] : memref<1x1x9x9x16xbf16, #tpu.memory_space<vmem>>, vector<1x1x8x8x16xbf16>
    %60 = vector.shape_cast %59 : vector<1x1x8x8x16xbf16> to vector<8x8x16xbf16>
    %61 = vector.shape_cast %60 : vector<8x8x16xbf16> to vector<64x16xbf16>
    %c160 = arith.constant 160 : index
    %c0_73 = arith.constant 0 : index
    %62 = vector.load %arg5[%c160, %c0_73] : memref<192x4xbf16, #tpu.memory_space<vmem>>, vector<16x4xbf16>
    %cst_74 = arith.constant dense<0.000000e+00> : vector<64x4xf32>
    %63 = tpu.matmul %61, %62, %cst_74 {dimension_numbers = #tpu.dot_dimension_numbers<[1], [0], [0], [1], [0, 0, 1, 1], [], []>} : vector<64x16xbf16>, vector<16x4xbf16>, vector<64x4xf32> -> vector<64x4xf32>
    %64 = arith.addf %58, %63 : vector<64x4xf32>
    %c0_75 = arith.constant 0 : index
    %c0_76 = arith.constant 0 : index
    %c1_77 = arith.constant 1 : index
    %c1_78 = arith.constant 1 : index
    %c0_79 = arith.constant 0 : index
    %65 = vector.load %arg4[%c0_75, %c0_76, %c1_77, %c1_78, %c0_79] : memref<1x1x9x9x16xbf16, #tpu.memory_space<vmem>>, vector<1x1x8x8x16xbf16>
    %66 = vector.shape_cast %65 : vector<1x1x8x8x16xbf16> to vector<8x8x16xbf16>
    %67 = vector.shape_cast %66 : vector<8x8x16xbf16> to vector<64x16xbf16>
    %c176 = arith.constant 176 : index
    %c0_80 = arith.constant 0 : index
    %68 = vector.load %arg5[%c176, %c0_80] : memref<192x4xbf16, #tpu.memory_space<vmem>>, vector<16x4xbf16>
    %cst_81 = arith.constant dense<0.000000e+00> : vector<64x4xf32>
    %69 = tpu.matmul %67, %68, %cst_81 {dimension_numbers = #tpu.dot_dimension_numbers<[1], [0], [0], [1], [0, 0, 1, 1], [], []>} : vector<64x16xbf16>, vector<16x4xbf16>, vector<64x4xf32> -> vector<64x4xf32>
    %70 = arith.addf %64, %69 : vector<64x4xf32>
    %c0_82 = arith.constant 0 : index
    %c0_83 = arith.constant 0 : index
    %71 = vector.load %arg6[%c0_82, %c0_83] : memref<1x4xf32, #tpu.memory_space<vmem>>, vector<1x4xf32>
    %72 = vector.broadcast %71 : vector<1x4xf32> to vector<64x4xf32>
    %73 = arith.addf %70, %72 : vector<64x4xf32>
    %c0_84 = arith.constant 0 : index
    %c0_85 = arith.constant 0 : index
    %c0_86 = arith.constant 0 : index
    %c0_87 = arith.constant 0 : index
    %74 = vector.load %arg7[%c0_84, %c0_85, %c0_86, %c0_87] : memref<1x1x64x4xf32, #tpu.memory_space<vmem>>, vector<1x1x64x4xf32>
    %75 = vector.shape_cast %74 : vector<1x1x64x4xf32> to vector<64x4xf32>
    %76 = vector.shape_cast %73 : vector<64x4xf32> to vector<1x1x64x4xf32>
    tpu.vector_store %arg7[%c0_84, %c0_85, %c0_86, %c0_87], %76 {strides = array<i32>} : memref<1x1x64x4xf32, #tpu.memory_space<vmem>>, vector<1x1x64x4xf32>,
    return
  }
  func.func @transform_0(%arg0: i32, %arg1: i32) -> (i32, i32, i32, i32, i32) {
    %c2_i32 = arith.constant 2 : i32
    %0 = arith.muli %c2_i32, %arg1 : i32
    %c0_i32 = arith.constant 0 : i32
    %1 = arith.addi %0, %c0_i32 : i32
    %c0_i32_0 = arith.constant 0 : i32
    %c0_i32_1 = arith.constant 0 : i32
    %c0_i32_2 = arith.constant 0 : i32
    %c0_i32_3 = arith.constant 0 : i32
    return %arg0, %1, %c0_i32_0, %c0_i32_1, %c0_i32_2 : i32, i32, i32, i32, i32
  }
  func.func @transform_1(%arg0: i32, %arg1: i32) -> (i32, i32, i32, i32, i32) {
    %c2_i32 = arith.constant 2 : i32
    %0 = arith.muli %c2_i32, %arg1 : i32
    %c1_i32 = arith.constant 1 : i32
    %1 = arith.addi %0, %c1_i32 : i32
    %c0_i32 = arith.constant 0 : i32
    %c0_i32_0 = arith.constant 0 : i32
    %c0_i32_1 = arith.constant 0 : i32
    %c0_i32_2 = arith.constant 0 : i32
    return %arg0, %1, %c0_i32, %c0_i32_0, %c0_i32_1 : i32, i32, i32, i32, i32
  }
  func.func @transform_2(%arg0: i32, %arg1: i32) -> (i32, i32, i32, i32, i32) {
    %c2_i32 = arith.constant 2 : i32
    %0 = arith.muli %c2_i32, %arg1 : i32
    %c2_i32_0 = arith.constant 2 : i32
    %1 = arith.addi %0, %c2_i32_0 : i32
    %c0_i32 = arith.constant 0 : i32
    %c0_i32_1 = arith.constant 0 : i32
    %c0_i32_2 = arith.constant 0 : i32
    %c0_i32_3 = arith.constant 0 : i32
    return %arg0, %1, %c0_i32, %c0_i32_1, %c0_i32_2 : i32, i32, i32, i32, i32
  }
  func.func @transform_3(%arg0: i32, %arg1: i32) -> (i32, i32) {
    %c0_i32 = arith.constant 0 : i32
    %c0_i32_0 = arith.constant 0 : i32
    %c0_i32_1 = arith.constant 0 : i32
    return %c0_i32, %c0_i32_0 : i32, i32
  }
  func.func @transform_4(%arg0: i32, %arg1: i32) -> (i32, i32) {
    %c0_i32 = arith.constant 0 : i32
    %c0_i32_0 = arith.constant 0 : i32
    %c0_i32_1 = arith.constant 0 : i32
    return %c0_i32, %c0_i32_0 : i32, i32
  }
  func.func @transform_5(%arg0: i32, %arg1: i32) -> (i32, i32, i32, i32) {
    %c0_i32 = arith.constant 0 : i32
    %c0_i32_0 = arith.constant 0 : i32
    %c0_i32_1 = arith.constant 0 : i32
    return %arg0, %arg1, %c0_i32, %c0_i32_0 : i32, i32, i32, i32
  }
}

</mosaic_0001>

<bundles_post_ra>
// kernel: _lambda_.1
= control target key start
LH: loop header
LB: loop body
LE: loop exit
PB: predicated region body
PF: predicated region fallthrough
CT: control target
= control target key end

     0   :  { %s3254_s18 = smov 0   ;;  %s3256_s19 = smov 0   ;;  %s3758_s0 = inlined_call_operand.vmem [shape: bf16[2,10,9,9,16], index: 0, kind: input, shape index: {}, may-alias: {0,1,2}]   ;;  %s3759_s1 = inlined_call_operand.vmem [shape: bf16[2,10,9,9,16], index: 1, kind: input, shape index: {}, may-alias: {0,1,2}]   ;;  %s3760_s2 = inlined_call_operand.vmem [shape: bf16[2,10,9,9,16], index: 2, kind: input, shape index: {}, may-alias: {0,1,2}]   ;;  %s3761_s3 = inlined_call_operand.vmem [shape: bf16[192,4], index: 3, kind: input, shape index: {}]   ;;  %s3762_s4 = inlined_call_operand.vmem [shape: f32[1,4], index: 4, kind: input, shape index: {}]   ;;  %s3763_s5 = inlined_call_operand.vmem [shape: f32[2,4,64,4], index: 5, kind: output, shape index: {}]  }
   0x1   :  { %s3258_s20 = smov 0   ;;  %s3260_s21 = smov 0  }
   0x2   :  { %s3262_s22 = smov 0  }
   0x3 LB: > { %s24_s23 = sadd.s32 1, %s3214_s20  ;;  %s27_s24 = sadd.s32 1, %s3218_s21  ;;  %s3222_s22 = sphi %s3262_s22, %s15_s22   ;;  %s3218_s21 = sphi %s3260_s21, %s3770_s21   ;;  %s3214_s20 = sphi %s3258_s20, %s3769_s20   ;;  %s3210_s19 = sphi %s3256_s19, %s3768_s19   ;;  %s3206_s18 = sphi %s3254_s18, %s3767_s18  }
   0x4   : > { %p25_p0 = scmp.ge.s32.totalorder %s24_s23, 4  ;;  %p2643_p1 = scmp.ge.s32.totalorder %s3222_s22, 1 }
   0x5   : > { %p259_p2 = scmp.lt.s32.totalorder %s3222_s22, 9 }
   0x6   : > { %s3772_s23 = smov (%p25_p0, %s24_s23), 0  ;;  %s3774_s24 = smov (!%p25_p0, %s27_s24), %s3218_s21 }
   0x7   : > { %p260_p3 = pnand %p2643_p1, %p259_p2  ;;  %p29_p4 = scmp.ge.s32.totalorder %s3774_s24, 2 }
   0x8   : > { %v3148_v0 = vld [vmem:[%s3761_s3 + $0x30] sm:$0xff] (!%p260_p3)   ;;  %s3290_s27 = sshll.u32 (!%p260_p3), %s3206_s18, 1  ;;  %p319_p5 = scmp.lt.s32.totalorder (!%p260_p3), %s3210_s19, 1  ;;  %v3151_v1 = vld [vmem:[%s3761_s3 + $0x8] sm:$0xff] (!%p260_p3)   ;;  %v3302_v2 = vld [vmem:[%s3761_s3] sm:$0xff] (!%p260_p3)   ;;  %vm518_vm0 = vcmask (!%p260_p3), 130048  }
   0x9   : > { %s3776_s24 = smov (%p29_p4, %s3774_s24), 0  ;;  %263 = sbr.rel (%p260_p3) target bundleno = 369 (0x171), region = 40 }
   0xa   : > { %s330_s28 = sadd.s32 (!%p260_p3), 1, %s3290_s27  ;;  %2956 = vmatprep.subr.bf16.mxu0 (!%p260_p3), %v3148_v0  ;;  %p321_p7 = scmp.lt.s32.totalorder (!%p260_p3), %s3290_s27, 9  ;;  %2896 = vmatprep.subr.bf16.mxu1 (!%p260_p3), %v3151_v1  ;;  %v3154_v3 = vld [vmem:[%s3761_s3 + $0x38] sm:$0xff] (!%p260_p3)   ;;  %vm383_vm1 = vsmask.f32 (!%p260_p3), 3328  ;;  %v3321_v4 = vld [vmem:[%s3761_s3 + $0x40] sm:$0xff] (!%p260_p3)  }
   0xb   : > { %p333_p6 = scmp.lt.s32.totalorder (!%p260_p3), %s330_s28, 9  ;;  %2957 = vmatpush3.bf16.msra.mxu0 (!%p260_p3), %v3148_v0  ;;  %2897 = vmatpush3.bf16.msra.mxu1 (!%p260_p3), %v3151_v1  ;;  %vm384_vm2 = vsmask.f32 (!%p260_p3), 7440  ;;  %s343_s6 = sadd.s32 (!%p260_p3), 2, %s3290_s27  ;;  %vm2487_vm4 = vcmask (!%p260_p3), 31744  }
   0xc   : > { %2906 = vmatprep.subr.bf16.mxu1 (!%p260_p3), %v3302_v2  ;;  %2966 = vmatprep.subr.bf16.mxu0 (!%p260_p3), %v3154_v3  ;;  %vm3364_vm3 = vmor (!%p260_p3), %vm383_vm1, %vm384_vm2  ;;  %p3373_p8 = scmp.lt.s32.totalorder (!%p260_p3), %s343_s6, 9  ;;  %p357_p9 = scmp.lt.s32.totalorder (!%p260_p3), %s3206_s18, 3 }
  0x10   : > { %s3778_s19 = smov (!%p319_p5, %s3210_s19), 1  ;;  %s3780_s28 = smov (!%p333_p6, %s330_s28), 9 }
  0x11   : > { %s3305_s8 = smul.u32 180, %s3778_s19  ;;  %s3782_s6 = smov (!%p3373_p8, %s343_s6), 9 }
  0x12   : > { %s3106_s11 = smul.u32 18, %s3780_s28  ;;  %s3784_s18 = smov (!%p357_p9, %s3206_s18), 3 }
  0x13   : > { %s322_s12 = scalar_select %p321_p7, %s3290_s27, 9 }
  0x14   : > { %s337_s13 = sadd.s32 %s3106_s11, %s3305_s8 }
  0x15   : > { %s2647_s14 = sshll.u32 %s337_s13, 2  ;;  %s3104_s15 = smul.u32 18, %s322_s12 }
  0x16   : > { %s3316_s25 = scalar_lea.vmem %s3759_s1, %s2647_s14  ;;  %s3107_s13 = smul.u32 18, %s3782_s6 }
  0x17   : > { %v3149_v5 = vld [vmem:[%s3316_s25 + $0x8] ss:$8 sps:$4 sm:$0xff]   ;;  %s325_s28 = sadd.s32 %s3305_s8, %s3104_s15  ;;  %v3150_v6 = vld [vmem:[%s3316_s25 + $0x18] ss:$8 sps:$4 sm:$0xff]   ;;  %v2749_v0 = vld [vmem:[%s3316_s25 + $0xc] sm:$0x1] }
  0x18   : > { %2958 = vmatprep.mubr.msk.bf16.mxu0 %vm518_vm0, %v3149_v5  ;;  %s2645_s30 = sshll.u32 %s325_s28, 2  ;;  %v3153_v7 = vld [vmem:[%s3316_s25 + $0x28] ss:$8 sps:$4 sm:$0xff]   ;;  %v3155_v34 = vld [vmem:[%s3316_s25 + $0x38] ss:$8 sps:$4 sm:$0xff]   ;;  %s3427_s14 = sadd.s32 %s3107_s13, %s3305_s8 }
  0x19   : > { %2959 = vmatmul.mubr.msk.bf16.vlgmr.msra.gmra.mrb[0].mxu0 %vm518_vm0, %v3150_v6  ;;  %s3332_s10 = scalar_lea.vmem %s3758_s0, %s2645_s30  ;;  %v2748_v59 = vld [vmem:[%s3316_s25 + $0x8] sm:$0xf]  ;;  %s2649_s8 = sshll.u32 %s3427_s14, 2 }
  0x1a   : > { %v3336_v8 = vld [vmem:[%s3332_s10] sm:$0xf]  ;;  %v3339_v9 = vld [vmem:[%s3332_s10 + $0x8] sm:$0xf]  ;;  %v375_v10 = vld [vmem:[%s3332_s10 + $0x4] sm:$0x1]  ;;  %2967 = vmatpush3.bf16.msra.mxu0 %v3154_v3  ;;  %2962 = vmatprep.mubr.msk.bf16.mxu0 %vm518_vm0, %v3153_v7  ;;  %s3450_s17 = scalar_lea.vmem %s3760_s2, %s2649_s8 }
  0x1b   : > { %v376_v11 = vld [vmem:[%s3332_s10 + $0xc] sm:$0x1]  ;;  %v387_v12 = vshrl.u32 %v3336_v8, 16  ;;  %v390_v13 = vshll.u32 %v3336_v8, 16  ;;  %v396_v14 = vshll.u32 %v375_v10, 16  ;;  %v401_v15 = vshrl.u32 %v3339_v9, 16  ;;  %2976 = vmatprep.subr.bf16.mxu0 %v3321_v4 }
  0x1c   : > { %v404_v16 = vshll.u32 %v3339_v9, 16  ;;  %v410_v17 = vshll.u32 %v376_v11, 16  ;;  %v3350_v18 = vld [vmem:[%s3332_s10 + $0x10] sm:$0xf]  ;;  %v3353_v19 = vld [vmem:[%s3332_s10 + $0x18] sm:$0xf] }
  0x1d   : > { %v389_v20 = vrot.slane %v387_v12, 4  ;;  %v392_v21 = vrot.slane %v390_v13, 5  ;;  %v398_v22 = vrot.slane %v396_v14, 5  ;;  %v403_v23 = vrot.slane %v401_v15, 4  ;;  %v377_v24 = vld [vmem:[%s3332_s10 + $0x14] sm:$0x1] }
  0x1e   : > { %v406_v25 = vrot.slane %v404_v16, 5  ;;  %v412_v26 = vrot.slane %v410_v17, 5  ;;  %v378_v27 = vld [vmem:[%s3332_s10 + $0x1c] sm:$0x1]  ;;  %v415_v28 = vshrl.u32 %v3350_v18, 16  ;;  %v418_v29 = vshll.u32 %v3350_v18, 16 }
  0x1f   : > { %v393_v30 = vor.u32 %v392_v21, %v389_v20  ;;  %v424_v31 = vshll.u32 %v377_v24, 16  ;;  %v429_v32 = vshrl.u32 %v3353_v19, 16  ;;  %v432_v33 = vshll.u32 %v3353_v19, 16  ;;  %v3369_v40 = vld [vmem:[%s3332_s10 + $0x20] sm:$0xf]  ;;  %v3409_v15 = vld [vmem:[%s3761_s3 + $0x10] sm:$0xff]  }
  0x20   : > { %v407_v36 = vor.u32 %v406_v25, %v403_v23  ;;  %v417_v37 = vrot.slane %v415_v28, 4  ;;  %v420_v38 = vrot.slane %v418_v29, 5  ;;  %v438_v39 = vshll.u32 %v378_v27, 16  ;;  %v3379_v44 = vld [vmem:[%s3332_s10 + $0x28] sm:$0xf] }
  0x21   : > { %v394_v41 = vrot.slane %v393_v30, 4  ;;  %v431_v42 = vrot.slane %v429_v32, 4  ;;  %v434_v43 = vrot.slane %v432_v33, 5  ;;  %2963 = vmatmul.mubr.msk.bf16.gmra.mrb[4].mxu0 %vm518_vm0, %v3155_v34  ;;  %v426_v47 = vrot.slane %v424_v31, 5  ;;  %v379_v49 = vld [vmem:[%s3332_s10 + $0x24] sm:$0x1] }
  0x22   : > { %v408_v45 = vrot.slane %v407_v36, 4  ;;  %v421_v46 = vor.u32 %v420_v38, %v417_v37  ;;  %v440_v48 = vrot.slane %v438_v39, 5  ;;  %v380_v52 = vld [vmem:[%s3332_s10 + $0x2c] sm:$0x1]  ;;  %v443_v53 = vshrl.u32 %v3369_v40, 16 }
  0x23   : > { %v399_v50 = vsel %vm3364_vm3, %v394_v41, %v398_v22  ;;  %v435_v51 = vor.u32 %v434_v43, %v431_v42  ;;  %v446_v54 = vshll.u32 %v3369_v40, 16  ;;  %v452_v57 = vshll.u32 %v379_v49, 16  ;;  %v2750_v7 = vld [vmem:[%s3316_s25 + $0x10] sm:$0xf]  ;;  %v2751_v13 = vld [vmem:[%s3316_s25 + $0x14] sm:$0x1] }
  0x24   : > { %v413_v55 = vsel %vm3364_vm3, %v408_v45, %v412_v26  ;;  %v422_v56 = vrot.slane %v421_v46, 4  ;;  %v457_v58 = vshrl.u32 %v3379_v44, 16  ;;  %v445_v62 = vrot.slane %v443_v53, 4  ;;  %v3412_v22 = vld [vmem:[%s3332_s10 + $0x30] sm:$0xf] }
  0x25   : > { %v2653_v60 = vcombine.low %v399_v50, %v413_v55  ;;  %v436_v61 = vrot.slane %v435_v51, 4  ;;  %v448_v63 = vrot.slane %v446_v54, 5  ;;  %v454_v3 = vrot.slane %v452_v57, 5  ;;  %v3416_v27 = vld [vmem:[%s3332_s10 + $0x38] sm:$0xf] }
  0x26   : > { %v427_v1 = vsel %vm3364_vm3, %v422_v56, %v426_v47  ;;  %v459_v5 = vrot.slane %v457_v58, 4  ;;  %v460_v6 = vshll.u32 %v3379_v44, 16  ;;  %v466_v12 = vshll.u32 %v380_v52, 16  ;;  %v381_v32 = vld [vmem:[%s3332_s10 + $0x34] sm:$0x1] }
  0x27   : > { %2898 = vmatprep.mubr.msk.bf16.mxu1 %vm518_vm0, %v2653_v60  ;;  %v441_v10 = vsel %vm3364_vm3, %v436_v61, %v440_v48  ;;  %v449_v11 = vor.u32 %v448_v63, %v445_v62  ;;  %v1547_v14 = vshrl.u32 %v2748_v59, 16  ;;  %v1550_v20 = vshll.u32 %v2748_v59, 16  ;;  %v382_v43 = vld [vmem:[%s3332_s10 + $0x3c] sm:$0x1]  ;;  %v2752_v52 = vld [vmem:[%s3316_s25 + $0x18] sm:$0xf] }
  0x28   : > { %v2654_v16 = vcombine.low %v427_v1, %v441_v10  ;;  %v462_v17 = vrot.slane %v460_v6, 5  ;;  %v1556_v21 = vshll.u32 %v2749_v0, 16  ;;  %v468_v24 = vrot.slane %v466_v12, 5  ;;  %v2753_v53 = vld [vmem:[%s3316_s25 + $0x1c] sm:$0x1] }
  0x29   : > { %v450_v23 = vrot.slane %v449_v11, 4  ;;  %v1549_v25 = vrot.slane %v1547_v14, 4  ;;  %v1561_v26 = vshrl.u32 %v2750_v7, 16  ;;  %v1552_v29 = vrot.slane %v1550_v20, 5  ;;  %v2754_v58 = vld [vmem:[%s3316_s25 + $0x20] sm:$0xf] }
  0x2a   : > { %2899 = vmatmul.mubr.msk.bf16.vlgmr.msra.gmra.mrb[0].mxu1 %vm518_vm0, %v2654_v16  ;;  %v463_v28 = vor.u32 %v462_v17, %v459_v5  ;;  %v1558_v30 = vrot.slane %v1556_v21, 5  ;;  %v1564_v31 = vshll.u32 %v2750_v7, 16  ;;  %v1570_v36 = vshll.u32 %v2751_v13, 16  ;;  %v2755_v63 = vld [vmem:[%s3316_s25 + $0x24] sm:$0x1] }
  0x2b   : > { %2907 = vmatpush3.bf16.msra.mxu1 %v3302_v2  ;;  %v455_v33 = vsel %vm3364_vm3, %v450_v23, %v454_v3  ;;  %v1563_v34 = vrot.slane %v1561_v26, 4  ;;  %v471_v37 = vshrl.u32 %v3412_v22, 16  ;;  %v1553_v39 = vor.u32 %v1552_v29, %v1549_v25  ;;  %v2756_v6 = vld [vmem:[%s3316_s25 + $0x28] sm:$0xf]  ;;  %v2757_v13 = vld [vmem:[%s3316_s25 + $0x2c] sm:$0x1] }
  0x2c   : > { %v464_v38 = vrot.slane %v463_v28, 4  ;;  %v1566_v41 = vrot.slane %v1564_v31, 5  ;;  %v474_v42 = vshll.u32 %v3412_v22, 16  ;;  %2916 = vmatprep.subr.bf16.mxu1 %v3409_v15  ;;  %v1572_v2 = vrot.slane %v1570_v36, 5  ;;  %v2758_v14 = vld [vmem:[%s3316_s25 + $0x30] sm:$0xf] }
  0x2d   : > { %v473_v45 = vrot.slane %v471_v37, 4  ;;  %v480_v46 = vshll.u32 %v381_v32, 16  ;;  %v485_v47 = vshrl.u32 %v3416_v27, 16  ;;  %v1554_v49 = vrot.slane %v1553_v39, 4  ;;  %v2759_v28 = vld [vmem:[%s3316_s25 + $0x34] sm:$0x1] }
  0x2e   : > { %v469_v48 = vsel %vm3364_vm3, %v464_v38, %v468_v24  ;;  %v1567_v50 = vor.u32 %v1566_v41, %v1563_v34  ;;  %v476_v51 = vrot.slane %v474_v42, 5  ;;  %v488_v57 = vshll.u32 %v3416_v27, 16  ;;  %v2761_v39 = vld [vmem:[%s3316_s25 + $0x3c] sm:$0x1] }
  0x2f   : > { %v2655_v54 = vcombine.low %v455_v33, %v469_v48  ;;  %v482_v55 = vrot.slane %v480_v46, 5  ;;  %v487_v56 = vrot.slane %v485_v47, 4  ;;  %v1559_v59 = vsel %vm3364_vm3, %v1554_v49, %v1558_v30  ;;  %v2760_v33 = vld [vmem:[%s3316_s25 + $0x38] sm:$0xf] }
  0x30   : > { %v1568_v60 = vrot.slane %v1567_v50, 4  ;;  %v477_v61 = vor.u32 %v476_v51, %v473_v45  ;;  %v494_v62 = vshll.u32 %v382_v43, 16  ;;  %v490_v0 = vrot.slane %v488_v57, 5  ;;  %v2762_v45 = vld [vmem:[%s3316_s25 + $0x40] sm:$0xf] }
  0x31   : > { %2902 = vmatprep.mubr.msk.bf16.mxu1 %vm518_vm0, %v2655_v54  ;;  %v1575_v1 = vshrl.u32 %v2752_v52, 16  ;;  %v1578_v3 = vshll.u32 %v2752_v52, 16  ;;  %v1584_v5 = vshll.u32 %v2753_v53, 16  ;;  %v1589_v12 = vshrl.u32 %v2754_v58, 16  ;;  %v2763_v52 = vld [vmem:[%s3316_s25 + $0x44] sm:$0x1] }
  0x32   : > { %v1573_v7 = vsel %vm3364_vm3, %v1568_v60, %v1572_v2  ;;  %v478_v10 = vrot.slane %v477_v61, 4  ;;  %v496_v11 = vrot.slane %v494_v62, 5  ;;  %v491_v17 = vor.u32 %v490_v0, %v487_v56 }
  0x33   : > { %v2764_v16 = vcombine.low %v1559_v59, %v1573_v7  ;;  %v1577_v20 = vrot.slane %v1575_v1, 4  ;;  %v1580_v21 = vrot.slane %v1578_v3, 5  ;;  %v1586_v24 = vrot.slane %v1584_v5, 5  ;;  %v3475_v7 = vld [vmem:[%s3761_s3 + $0x48] sm:$0xff]  }
  0x34   : > { %v483_v23 = vsel %vm3364_vm3, %v478_v10, %v482_v55  ;;  %v1591_v25 = vrot.slane %v1589_v12, 4  ;;  %v1592_v26 = vshll.u32 %v2754_v58, 16  ;;  %v492_v29 = vrot.slane %v491_v17, 4 }
  0x35   : > { %2968 = vmatprep.mubr.msk.bf16.mxu0 %vm518_vm0, %v2764_v16  ;;  %v1581_v30 = vor.u32 %v1580_v21, %v1577_v20  ;;  %v1598_v31 = vshll.u32 %v2755_v63, 16  ;;  %v1603_v32 = vshrl.u32 %v2756_v6, 16  ;;  %v2662_v36 = vcombine.low %v3336_v8, %v3339_v9  ;;  %v3486_v21 = vld [vmem:[%s3761_s3 + $0x18] sm:$0xff]  }
  0x36   : > { %v1594_v34 = vrot.slane %v1592_v26, 5  ;;  %v1606_v37 = vshll.u32 %v2756_v6, 16  ;;  %v1617_v38 = vshrl.u32 %v2758_v14, 16  ;;  %v497_v41 = vsel %vm3364_vm3, %v492_v29, %v496_v11 }
  0x37   : > { %v1582_v42 = vrot.slane %v1581_v30, 4  ;;  %v1605_v2 = vrot.slane %v1603_v32, 4  ;;  %v1612_v43 = vshll.u32 %v2757_v13, 16  ;;  %v2656_v46 = vcombine.low %v483_v23, %v497_v41 }
  0x38   : > { %v1595_v47 = vor.u32 %v1594_v34, %v1591_v25  ;;  %v1600_v48 = vrot.slane %v1598_v31, 5  ;;  %v1608_v49 = vrot.slane %v1606_v37, 5  ;;  %v1619_v51 = vrot.slane %v1617_v38, 4  ;;  %v1884_v25 = vld [vmem:[%s3450_s17] sm:$0xf] }
  0x39   : > { %v1587_v50 = vsel %vm3364_vm3, %v1582_v42, %v1586_v24  ;;  %v1620_v8 = vshll.u32 %v2758_v14, 16  ;;  %v1626_v9 = vshll.u32 %v2759_v28, 16  ;;  %2903 = vmatmul.mubr.msk.bf16.gmra.mrb[4].mxu1 %vm518_vm0, %v2656_v46  ;;  %v1631_v55 = vshrl.u32 %v2760_v33, 16  ;;  %v1887_v28 = vld [vmem:[%s3450_s17 + $0xc] sm:$0x1] }
  0x3a   : > { %v1596_v53 = vrot.slane %v1595_v47, 4  ;;  %v1609_v54 = vor.u32 %v1608_v49, %v1605_v2  ;;  %v1634_v56 = vshll.u32 %v2760_v33, 16  ;;  %2908 = vmatprep.mubr.msk.bf16.mxu1 %vm518_vm0, %v2662_v36  ;;  %v1614_v57 = vrot.slane %v1612_v43, 5  ;;  %v3161_v36 = vld [vmem:[%s3450_s17] ss:$8 sps:$4 sm:$0xff]  }
  0x3b   : > { %v1622_v58 = vrot.slane %v1620_v8, 5  ;;  %v1640_v59 = vshll.u32 %v2761_v39, 16  ;;  %v1645_v60 = vshrl.u32 %v2762_v45, 16  ;;  %v1633_v63 = vrot.slane %v1631_v55, 4  ;;  %v3164_v38 = vld [vmem:[%s3332_s10 + $0x8] ss:$8 sps:$4 sm:$0xff]  }
  0x3c   : > { %v1601_v61 = vsel %vm3364_vm3, %v1596_v53, %v1600_v48  ;;  %v1610_v62 = vrot.slane %v1609_v54, 4  ;;  %v1636_v0 = vrot.slane %v1634_v56, 5  ;;  %v1628_v5 = vrot.slane %v1626_v9, 5  ;;  %v1888_v48 = vld [vmem:[%s3450_s17 + $0x10] sm:$0xf] }
  0x3d   : > { %v2765_v1 = vcombine.low %v1587_v50, %v1601_v61  ;;  %v1623_v3 = vor.u32 %v1622_v58, %v1619_v51  ;;  %v2663_v6 = vcombine.low %v3350_v18, %v3353_v19  ;;  %v1647_v11 = vrot.slane %v1645_v60, 4  ;;  %v1889_v49 = vld [vmem:[%s3450_s17 + $0x14] sm:$0x1]  ;;  %v1890_v8 = vld [vmem:[%s3450_s17 + $0x18] sm:$0xf] }
  0x3e   : > { %v1637_v10 = vor.u32 %v1636_v0, %v1633_v63  ;;  %v1648_v12 = vshll.u32 %v2762_v45, 16  ;;  %v1654_v13 = vshll.u32 %v2763_v52, 16  ;;  %v1615_v14 = vsel %vm3364_vm3, %v1610_v62, %v1614_v57  ;;  %v1891_v9 = vld [vmem:[%s3450_s17 + $0x1c] sm:$0x1]  ;;  %v2688_v58 = vld [vmem:[%s3332_s10 + $0x8] sm:$0xf] }
  0x3f   : > { %2969 = vmatmul.mubr.msk.bf16.vlgmr.msra.gmra.mrb[0].mxu0 %vm518_vm0, %v2765_v1  ;;  %v1624_v16 = vrot.slane %v1623_v3, 4  ;;  %v2664_v18 = vcombine.low %v3369_v40, %v3379_v44  ;;  %v1642_v17 = vrot.slane %v1640_v59, 5  ;;  %v1885_v44 = vld [vmem:[%s3450_s17 + $0x4] sm:$0x1]  ;;  %v1901_v29 = vshrl.u32 %v1884_v25, 16 }
  0x40   : > { %v1638_v19 = vrot.slane %v1637_v10, 4  ;;  %v1650_v20 = vrot.slane %v1648_v12, 5  ;;  %2977 = vmatpush3.bf16.msra.mxu0 %v3321_v4  ;;  %v1656_v24 = vrot.slane %v1654_v13, 5  ;;  %v1886_v4 = vld [vmem:[%s3450_s17 + $0x8] sm:$0xf]  ;;  %v1904_v30 = vshll.u32 %v1884_v25, 16 }
  0x41   : > { %v1629_v23 = vsel %vm3364_vm3, %v1624_v16, %v1628_v5  ;;  %2986 = vmatprep.subr.bf16.mxu0 %v3475_v7  ;;  %2909 = vmatmul.mubr.msk.bf16.vlgmr.msra.gmra.mrb[0].mxu1 %vm518_vm0, %v2663_v6  ;;  %v1910_v31 = vshll.u32 %v1885_v44, 16  ;;  %v1915_v32 = vshrl.u32 %v1886_v4, 16  ;;  %v1918_v37 = vshll.u32 %v1886_v4, 16  ;;  %v2689_v61 = vld [vmem:[%s3332_s10 + $0xc] sm:$0x1] }
  0x42   : > { %v2766_v26 = vcombine.low %v1615_v14, %v1629_v23  ;;  %v1651_v40 = vor.u32 %v1650_v20, %v1647_v11  ;;  %2917 = vmatpush3.bf16.msra.mxu1 %v3409_v15  ;;  %2912 = vmatprep.mubr.msk.bf16.mxu1 %vm518_vm0, %v2664_v18  ;;  %v1643_v33 = vsel %vm3364_vm3, %v1638_v19, %v1642_v17  ;;  %v1924_v15 = vshll.u32 %v1887_v28, 16  ;;  %v2690_v3 = vld [vmem:[%s3332_s10 + $0x10] sm:$0xf]  ;;  %v2691_v12 = vld [vmem:[%s3332_s10 + $0x14] sm:$0x1] }
  0x43   : > { %2926 = vmatprep.subr.bf16.mxu1 %v3486_v21  ;;  %v1903_v39 = vrot.slane %v1901_v29, 4  ;;  %v1906_v41 = vrot.slane %v1904_v30, 5  ;;  %v1912_v42 = vrot.slane %v1910_v31, 5  ;;  %v1917_v2 = vrot.slane %v1915_v32, 4  ;;  %v3163_v5 = vld [vmem:[%s3450_s17 + $0x10] ss:$8 sps:$4 sm:$0xff]  }
  0x44   : > { %2972 = vmatprep.mubr.msk.bf16.mxu0 %vm518_vm0, %v2766_v26  ;;  %v1652_v34 = vrot.slane %v1651_v40, 4  ;;  %v2665_v45 = vcombine.low %v3412_v22, %v3416_v27  ;;  %v1920_v46 = vrot.slane %v1918_v37, 5  ;;  %v1926_v47 = vrot.slane %v1924_v15, 5  ;;  %v3166_v14 = vld [vmem:[%s3450_s17 + $0x20] ss:$8 sps:$4 sm:$0xff]  }
  0x45   : > { %v1907_v51 = vor.u32 %v1906_v41, %v1903_v39  ;;  %v1929_v52 = vshrl.u32 %v1888_v48, 16  ;;  %v1932_v53 = vshll.u32 %v1888_v48, 16  ;;  %v1938_v55 = vshll.u32 %v1889_v49, 16  ;;  %v3168_v16 = vld [vmem:[%s3332_s10 + $0x18] ss:$8 sps:$4 sm:$0xff]   ;;  %v3550_v49 = vld [vmem:[%s3761_s3 + $0x50] sm:$0xff]  }
  0x46   : > { %v1657_v43 = vsel %vm3364_vm3, %v1652_v34, %v1656_v24  ;;  %v1921_v54 = vor.u32 %v1920_v46, %v1917_v2  ;;  %v1943_v56 = vshrl.u32 %v1890_v8, 16  ;;  %v1946_v57 = vshll.u32 %v1890_v8, 16  ;;  %v1892_v23 = vld [vmem:[%s3450_s17 + $0x20] sm:$0xf]  ;;  %v1893_v24 = vld [vmem:[%s3450_s17 + $0x24] sm:$0x1] }
  0x47   : > { %v2767_v50 = vcombine.low %v1643_v33, %v1657_v43  ;;  %v1908_v22 = vrot.slane %v1907_v51, 4  ;;  %v1931_v27 = vrot.slane %v1929_v52, 4  ;;  %v1934_v59 = vrot.slane %v1932_v53, 5  ;;  %v1894_v4 = vld [vmem:[%s3450_s17 + $0x28] sm:$0xf]  ;;  %v3538_v37 = vld [vmem:[%s3761_s3 + $0x20] sm:$0xff]  }
  0x48   : > { %v1952_v60 = vshll.u32 %v1891_v9, 16  ;;  %v1922_v62 = vrot.slane %v1921_v54, 4  ;;  %v1940_v63 = vrot.slane %v1938_v55, 5  ;;  %v1945_v0 = vrot.slane %v1943_v56, 4  ;;  %v3170_v28 = vld [vmem:[%s3332_s10 + $0x28] ss:$8 sps:$4 sm:$0xff]  }
  0x49   : > { %2973 = vmatmul.mubr.msk.bf16.gmra.mrb[4].mxu0 %vm518_vm0, %v2767_v50  ;;  %2913 = vmatmul.mubr.msk.bf16.gmra.mrb[4].mxu1 %vm518_vm0, %v2665_v45  ;;  %v1948_v1 = vrot.slane %v1946_v57, 5  ;;  %v1913_v6 = vsel %vm3364_vm3, %v1908_v22, %v1912_v42  ;;  %v1935_v10 = vor.u32 %v1934_v59, %v1931_v27  ;;  %v838_v13 = vshrl.u32 %v2688_v58, 16  ;;  %v1895_v42 = vld [vmem:[%s3450_s17 + $0x2c] sm:$0x1]  ;;  %v2692_v43 = vld [vmem:[%s3332_s10 + $0x18] sm:$0xf] }
  0x4a   : > { %2978 = vmatprep.mubr.msk.bf16.mxu0 %vm518_vm0, %v3161_v36  ;;  %2918 = vmatprep.mubr.msk.bf16.mxu1 %vm518_vm0, %v3164_v38  ;;  %v1954_v11 = vrot.slane %v1952_v60, 5  ;;  %v1927_v18 = vsel %vm3364_vm3, %v1922_v62, %v1926_v47  ;;  %v841_v17 = vshll.u32 %v2688_v58, 16  ;;  %v847_v20 = vshll.u32 %v2689_v61, 16  ;;  %v2693_v52 = vld [vmem:[%s3332_s10 + $0x1c] sm:$0x1] }
  0x4b   : > { %v1949_v19 = vor.u32 %v1948_v1, %v1945_v0  ;;  %v3529_v25 = vcombine.low %v1913_v6, %v1927_v18  ;;  %v1936_v26 = vrot.slane %v1935_v10, 4  ;;  %v840_v40 = vrot.slane %v838_v13, 4  ;;  %v2694_v56 = vld [vmem:[%s3332_s10 + $0x20] sm:$0xf]  ;;  %v3169_v58 = vld [vmem:[%s3450_s17 + $0x30] ss:$8 sps:$4 sm:$0xff]  }
  0x4c   : > { %v852_v44 = vshrl.u32 %v2690_v3, 16  ;;  %v843_v30 = vrot.slane %v841_v17, 5  ;;  %v849_v31 = vrot.slane %v847_v20, 5  ;;  %v855_v32 = vshll.u32 %v2690_v3, 16  ;;  %v3171_v22 = vld [vmem:[%s3332_s10 + $0x38] ss:$8 sps:$4 sm:$0xff]  }
  0x4d   : > { %v1950_v29 = vrot.slane %v1949_v19, 4  ;;  %v1941_v33 = vsel %vm3364_vm3, %v1936_v26, %v1940_v63  ;;  %v861_v36 = vshll.u32 %v2691_v12, 16  ;;  %v1957_v15 = vshrl.u32 %v1892_v23, 16  ;;  %v2695_v62 = vld [vmem:[%s3332_s10 + $0x24] sm:$0x1] }
  0x4e   : > { %v854_v34 = vrot.slane %v852_v44, 4  ;;  %v844_v39 = vor.u32 %v843_v30, %v840_v40  ;;  %v857_v41 = vrot.slane %v855_v32, 5  ;;  %v1960_v2 = vshll.u32 %v1892_v23, 16  ;;  %v1896_v10 = vld [vmem:[%s3450_s17 + $0x30] sm:$0xf] }
  0x4f   : > { %v1955_v38 = vsel %vm3364_vm3, %v1950_v29, %v1954_v11  ;;  %v863_v46 = vrot.slane %v861_v36, 5  ;;  %v1959_v47 = vrot.slane %v1957_v15, 4  ;;  %v1966_v48 = vshll.u32 %v1893_v24, 16  ;;  %v1898_v18 = vld [vmem:[%s3450_s17 + $0x38] sm:$0xf] }
  0x50   : > { %v3545_v45 = vcombine.low %v1941_v33, %v1955_v38  ;;  %v845_v50 = vrot.slane %v844_v39, 4  ;;  %v858_v51 = vor.u32 %v857_v41, %v854_v34  ;;  %v1962_v8 = vrot.slane %v1960_v2, 5  ;;  %v1899_v24 = vld [vmem:[%s3450_s17 + $0x3c] sm:$0x1]  ;;  %v2696_v15 = vld [vmem:[%s3332_s10 + $0x28] sm:$0xf] }
  0x51   : > { %2979 = vmatmul.mubr.msk.bf16.vlgmr.msra.gmra.mrb[0].mxu0 %vm518_vm0, %v3163_v5  ;;  %2919 = vmatmul.mubr.msk.bf16.vlgmr.msra.gmra.mrb[0].mxu1 %vm518_vm0, %v3168_v16  ;;  %v1971_v9 = vshrl.u32 %v1894_v4, 16  ;;  %v1968_v53 = vrot.slane %v1966_v48, 5  ;;  %v1974_v54 = vshll.u32 %v1894_v4, 16  ;;  %v1980_v55 = vshll.u32 %v1895_v42, 16  ;;  %v1897_v16 = vld [vmem:[%s3450_s17 + $0x34] sm:$0x1] }
  0x52   : > { %2982 = vmatprep.mubr.msk.bf16.mxu0 %vm518_vm0, %v3166_v14  ;;  %2927 = vmatpush3.bf16.msra.mxu1 %v3486_v21  ;;  %v866_v57 = vshrl.u32 %v2692_v43, 16  ;;  %v850_v27 = vsel %vm3364_vm3, %v845_v50, %v849_v31  ;;  %v859_v59 = vrot.slane %v858_v51, 4  ;;  %v1963_v21 = vor.u32 %v1962_v8, %v1959_v47  ;;  %v2697_v38 = vld [vmem:[%s3332_s10 + $0x2c] sm:$0x1]  ;;  %v2698_v2 = vld [vmem:[%s3332_s10 + $0x30] sm:$0xf] }
  0x53   : > { %2987 = vmatpush3.bf16.msra.mxu0 %v3475_v7  ;;  %2922 = vmatprep.mubr.msk.bf16.mxu1 %vm518_vm0, %v3170_v28  ;;  %v1973_v60 = vrot.slane %v1971_v9, 4  ;;  %v1976_v7 = vrot.slane %v1974_v54, 5  ;;  %v1982_v61 = vrot.slane %v1980_v55, 5  ;;  %v869_v0 = vshll.u32 %v2692_v43, 16  ;;  %v2699_v50 = vld [vmem:[%s3332_s10 + $0x34] sm:$0x1] }
  0x54   : > { %2936 = vmatprep.subr.bf16.mxu1 %v3538_v37  ;;  %2996 = vmatprep.subr.bf16.mxu0 %v3550_v49  ;;  %v868_v63 = vrot.slane %v866_v57, 4  ;;  %v864_v1 = vsel %vm3364_vm3, %v859_v59, %v863_v46  ;;  %v1964_v3 = vrot.slane %v1963_v21, 4  ;;  %v875_v5 = vshll.u32 %v2693_v52, 16 }
  0x55   : > { %v880_v6 = vshrl.u32 %v2694_v56, 16  ;;  %v2704_v11 = vcombine.low %v850_v27, %v864_v1  ;;  %v1977_v12 = vor.u32 %v1976_v7, %v1973_v60  ;;  %v871_v13 = vrot.slane %v869_v0, 5  ;;  %v3599_v7 = vld [vmem:[%s3761_s3 + $0x58] sm:$0xff]   ;;  %v2702_v1 = vld [vmem:[%s3332_s10 + $0x40] sm:$0xf] }
  0x56   : > { %v883_v14 = vshll.u32 %v2694_v56, 16  ;;  %v1969_v19 = vsel %vm3364_vm3, %v1964_v3, %v1968_v53  ;;  %v877_v17 = vrot.slane %v875_v5, 5  ;;  %v889_v23 = vshll.u32 %v2695_v62, 16  ;;  %v2700_v53 = vld [vmem:[%s3332_s10 + $0x38] sm:$0xf] }
  0x57   : > { %v882_v20 = vrot.slane %v880_v6, 4  ;;  %v1978_v26 = vrot.slane %v1977_v12, 4  ;;  %v872_v40 = vor.u32 %v871_v13, %v868_v63  ;;  %v1985_v4 = vshrl.u32 %v1896_v10, 16  ;;  %v2703_v12 = vld [vmem:[%s3332_s10 + $0x44] sm:$0x1] }
  0x58   : > { %v885_v44 = vrot.slane %v883_v14, 5  ;;  %v891_v28 = vrot.slane %v889_v23, 5  ;;  %v1988_v29 = vshll.u32 %v1896_v10, 16  ;;  %v1994_v30 = vshll.u32 %v1897_v16, 16 }
  0x59   : > { %2983 = vmatmul.mubr.msk.bf16.gmra.mrb[4].mxu0 %vm518_vm0, %v3169_v58  ;;  %2923 = vmatmul.mubr.msk.bf16.gmra.mrb[4].mxu1 %vm518_vm0, %v3171_v22  ;;  %v1999_v31 = vshrl.u32 %v1898_v18, 16  ;;  %v1983_v32 = vsel %vm3364_vm3, %v1978_v26, %v1982_v61  ;;  %v873_v33 = vrot.slane %v872_v40, 4  ;;  %v1987_v36 = vrot.slane %v1985_v4, 4  ;;  %v2701_v58 = vld [vmem:[%s3332_s10 + $0x3c] sm:$0x1]  ;;  %v3594_v22 = vld [vmem:[%s3761_s3 + $0x28] sm:$0xff]  }
  0x5a   : > { %2988 = vmatprep.mubr.msk.bf16.mxu0 %vm518_vm0, %v3529_v25  ;;  %2928 = vmatprep.mubr.msk.bf16.mxu1 %vm518_vm0, %v2704_v11  ;;  %v886_v34 = vor.u32 %v885_v44, %v882_v20  ;;  %v2784_v25 = vcombine.low %v1969_v19, %v1983_v32  ;;  %v1990_v39 = vrot.slane %v1988_v29, 5  ;;  %v1996_v41 = vrot.slane %v1994_v30, 5  ;;  %v3174_v26 = vld [vmem:[%s3450_s17 + $0x8] ss:$8 sps:$4 sm:$0xff]   ;;  %s2651_s10 = sshll.u32 %s3778_s19, 5 }
  0x5b   : > { %v2001_v42 = vrot.slane %v1999_v31, 4  ;;  %v878_v43 = vsel %vm3364_vm3, %v873_v33, %v877_v17  ;;  %v2002_v47 = vshll.u32 %v1898_v18, 16  ;;  %v2008_v48 = vshll.u32 %v1899_v24, 16 }
  0x5c   : > { %v887_v46 = vrot.slane %v886_v34, 4  ;;  %v1991_v51 = vor.u32 %v1990_v39, %v1987_v36  ;;  %v894_v8 = vshrl.u32 %v2696_v15, 16  ;;  %v897_v9 = vshll.u32 %v2696_v15, 16 }
  0x5d   : > { %v903_v52 = vshll.u32 %v2697_v38, 16  ;;  %v2004_v55 = vrot.slane %v2002_v47, 5  ;;  %v2010_v56 = vrot.slane %v2008_v48, 5  ;;  %v908_v57 = vshrl.u32 %v2698_v2, 16  ;;  %v3175_v38 = vld [vmem:[%s3450_s17 + $0x18] ss:$8 sps:$4 sm:$0xff]  }
  0x5e   : > { %v892_v54 = vsel %vm3364_vm3, %v887_v46, %v891_v28  ;;  %v1992_v59 = vrot.slane %v1991_v51, 4  ;;  %v896_v21 = vrot.slane %v894_v8, 4  ;;  %v899_v60 = vrot.slane %v897_v9, 5  ;;  %v2810_v46 = vld [vmem:[%s3450_s17 + $0x10] sm:$0xf] }
  0x5f   : > { %v2705_v27 = vcombine.low %v878_v43, %v892_v54  ;;  %v2005_v61 = vor.u32 %v2004_v55, %v2001_v42  ;;  %v905_v62 = vrot.slane %v903_v52, 5  ;;  %v910_v63 = vrot.slane %v908_v57, 4  ;;  %v3176_v42 = vld [vmem:[%s3316_s25] ss:$8 sps:$4 sm:$0xff]   ;;  %v2809_v43 = vld [vmem:[%s3450_s17 + $0xc] sm:$0x1] }
  0x60   : > { %v911_v0 = vshll.u32 %v2698_v2, 16  ;;  %v900_v3 = vor.u32 %v899_v60, %v896_v21  ;;  %v917_v5 = vshll.u32 %v2699_v50, 16  ;;  %v922_v6 = vshrl.u32 %v2700_v53, 16  ;;  %v3178_v2 = vld [vmem:[%s3450_s17 + $0x28] ss:$8 sps:$4 sm:$0xff]  }
  0x61   : > { %2989 = vmatmul.mubr.msk.bf16.vlgmr.msra.gmra.mrb[0].mxu0 %vm518_vm0, %v3545_v45  ;;  %2929 = vmatmul.mubr.msk.bf16.vlgmr.msra.gmra.mrb[0].mxu1 %vm518_vm0, %v2705_v27  ;;  %v1997_v10 = vsel %vm3364_vm3, %v1992_v59, %v1996_v41  ;;  %v2006_v11 = vrot.slane %v2005_v61, 4  ;;  %v925_v13 = vshll.u32 %v2700_v53, 16  ;;  %v931_v18 = vshll.u32 %v2701_v58, 16  ;;  %v2811_v48 = vld [vmem:[%s3450_s17 + $0x14] sm:$0x1] }
  0x62   : > { %2992 = vmatprep.mubr.msk.bf16.mxu0 %vm518_vm0, %v2784_v25  ;;  %2937 = vmatpush3.bf16.msra.mxu1 %v3538_v37  ;;  %v913_v45 = vrot.slane %v911_v0, 5  ;;  %v901_v14 = vrot.slane %v900_v3, 4  ;;  %v924_v16 = vrot.slane %v922_v6, 4  ;;  %v936_v19 = vshrl.u32 %v2702_v1, 16  ;;  %v2808_v25 = vld [vmem:[%s3450_s17 + $0x8] sm:$0xf] }
  0x63   : > { %2997 = vmatpush3.bf16.msra.mxu0 %v3550_v49  ;;  %2946 = vmatprep.subr.bf16.mxu1 %v3594_v22  ;;  %v2011_v37 = vsel %vm3364_vm3, %v2006_v11, %v2010_v56  ;;  %v919_v20 = vrot.slane %v917_v5, 5  ;;  %v927_v23 = vrot.slane %v925_v13, 5  ;;  %v939_v40 = vshll.u32 %v2702_v1, 16  ;;  %v2812_v21 = vld [vmem:[%s3450_s17 + $0x18] sm:$0xf] }
  0x64   : > { %3006 = vmatprep.subr.bf16.mxu0 %v3599_v7  ;;  %v914_v17 = vor.u32 %v913_v45, %v910_v63  ;;  %v2785_v24 = vcombine.low %v1997_v10, %v2011_v37  ;;  %v938_v49 = vrot.slane %v936_v19, 4  ;;  %v906_v44 = vsel %vm3364_vm3, %v901_v14, %v905_v62  ;;  %v2813_v60 = vld [vmem:[%s3450_s17 + $0x1c] sm:$0x1]  ;;  %v2814_v62 = vld [vmem:[%s3450_s17 + $0x20] sm:$0xf] }
  0x65   : > { %v928_v28 = vor.u32 %v927_v23, %v924_v16  ;;  %v945_v29 = vshll.u32 %v2703_v12, 16  ;;  %v933_v30 = vrot.slane %v931_v18, 5  ;;  %v941_v31 = vrot.slane %v939_v40, 5  ;;  %v2815_v63 = vld [vmem:[%s3450_s17 + $0x24] sm:$0x1] }
  0x66   : > { %v915_v4 = vrot.slane %v914_v17, 4  ;;  %v2256_v47 = vshrl.u32 %v2808_v25, 16  ;;  %v2259_v50 = vshll.u32 %v2808_v25, 16  ;;  %v2265_v51 = vshll.u32 %v2809_v43, 16  ;;  %v1175_v11 = vld [vmem:[%s3316_s25] sm:$0xf] }
  0x67   : > { %v929_v33 = vrot.slane %v928_v28, 4  ;;  %v942_v36 = vor.u32 %v941_v31, %v938_v49  ;;  %v947_v15 = vrot.slane %v945_v29, 5  ;;  %v2270_v8 = vshrl.u32 %v2810_v46, 16  ;;  %v3180_v45 = vld [vmem:[%s3316_s25 + $0x10] ss:$8 sps:$4 sm:$0xff]  }
  0x68   : > { %v920_v32 = vsel %vm3364_vm3, %v915_v4, %v919_v20  ;;  %v2273_v9 = vshll.u32 %v2810_v46, 16  ;;  %v2258_v53 = vrot.slane %v2256_v47, 4  ;;  %v2279_v54 = vshll.u32 %v2811_v48, 16  ;;  %v1176_v18 = vld [vmem:[%s3316_s25 + $0x4] sm:$0x1] }
  0x69   : > { %2993 = vmatmul.mubr.msk.bf16.gmra.mrb[4].mxu0 %vm518_vm0, %v2785_v24  ;;  %v2706_v34 = vcombine.low %v906_v44, %v920_v32  ;;  %v934_v39 = vsel %vm3364_vm3, %v929_v33, %v933_v30  ;;  %v943_v41 = vrot.slane %v942_v36, 4  ;;  %v2261_v56 = vrot.slane %v2259_v50, 5  ;;  %v1177_v23 = vld [vmem:[%s3316_s25 + $0x8] sm:$0xf]  ;;  %v3181_v24 = vld [vmem:[%s3450_s17 + $0x38] ss:$8 sps:$4 sm:$0xff]  }
  0x6a   : > { %2998 = vmatprep.mubr.msk.bf16.mxu0 %vm518_vm0, %v3174_v26  ;;  %v2267_v57 = vrot.slane %v2265_v51, 5  ;;  %v2272_v58 = vrot.slane %v2270_v8, 4  ;;  %v2275_v27 = vrot.slane %v2273_v9, 5  ;;  %v2281_v59 = vrot.slane %v2279_v54, 5  ;;  %v3182_v26 = vld [vmem:[%s3316_s25 + $0x20] ss:$8 sps:$4 sm:$0xff]  }
  0x6b   : > { %2932 = vmatprep.mubr.msk.bf16.mxu1 %vm518_vm0, %v2706_v34  ;;  %v948_v52 = vsel %vm3364_vm3, %v943_v41, %v947_v15  ;;  %v2262_v61 = vor.u32 %v2261_v56, %v2258_v53  ;;  %v2284_v0 = vshrl.u32 %v2812_v21, 16  ;;  %v2287_v1 = vshll.u32 %v2812_v21, 16  ;;  %v1178_v29 = vld [vmem:[%s3316_s25 + $0xc] sm:$0x1]  ;;  %v2816_v32 = vld [vmem:[%s3450_s17 + $0x28] sm:$0xf] }
  0x6c   : > { %v2707_v55 = vcombine.low %v934_v39, %v948_v52  ;;  %v2276_v3 = vor.u32 %v2275_v27, %v2272_v58  ;;  %v2293_v5 = vshll.u32 %v2813_v60, 16  ;;  %v2298_v6 = vshrl.u32 %v2814_v62, 16  ;;  %v2818_v47 = vld [vmem:[%s3450_s17 + $0x30] sm:$0xf]  ;;  %v2819_v9 = vld [vmem:[%s3450_s17 + $0x34] sm:$0x1] }
  0x6d   : > { %v2301_v10 = vshll.u32 %v2814_v62, 16  ;;  %v2263_v12 = vrot.slane %v2262_v61, 4  ;;  %v2286_v13 = vrot.slane %v2284_v0, 4  ;;  %v2289_v14 = vrot.slane %v2287_v1, 5  ;;  %v1179_v53 = vld [vmem:[%s3316_s25 + $0x10] sm:$0xf] }
  0x6e   : > { %2933 = vmatmul.mubr.msk.bf16.gmra.mrb[4].mxu1 %vm518_vm0, %v2707_v55  ;;  %v2307_v16 = vshll.u32 %v2815_v63, 16  ;;  %v2277_v19 = vrot.slane %v2276_v3, 4  ;;  %v2295_v37 = vrot.slane %v2293_v5, 5  ;;  %v2300_v17 = vrot.slane %v2298_v6, 4  ;;  %v3183_v54 = vld [vmem:[%s3316_s25 + $0x30] ss:$8 sps:$4 sm:$0xff]  }
  0x6f   : > { %2938 = vmatprep.mubr.msk.bf16.mxu1 %vm518_vm0, %v3176_v42  ;;  %v2303_v20 = vrot.slane %v2301_v10, 5  ;;  %v2268_v49 = vsel %vm3364_vm3, %v2263_v12, %v2267_v57  ;;  %v2290_v40 = vor.u32 %v2289_v14, %v2286_v13  ;;  %v1195_v30 = vshll.u32 %v1175_v11, 16  ;;  %v2817_v42 = vld [vmem:[%s3450_s17 + $0x2c] sm:$0x1]  ;;  %v1180_v60 = vld [vmem:[%s3316_s25 + $0x14] sm:$0x1] }
  0x70   : > { %v2309_v44 = vrot.slane %v2307_v16, 5  ;;  %v2282_v4 = vsel %vm3364_vm3, %v2277_v19, %v2281_v59  ;;  %v1201_v31 = vshll.u32 %v1176_v18, 16  ;;  %v1206_v15 = vshrl.u32 %v1177_v23, 16  ;;  %v1181_v0 = vld [vmem:[%s3316_s25 + $0x18] sm:$0xf] }
  0x71   : > { %2999 = vmatmul.mubr.msk.bf16.vlgmr.msra.gmra.mrb[0].mxu0 %vm518_vm0, %v3175_v38  ;;  %v2304_v28 = vor.u32 %v2303_v20, %v2300_v17  ;;  %v2824_v33 = vcombine.low %v2268_v49, %v2282_v4  ;;  %v2291_v34 = vrot.slane %v2290_v40, 4  ;;  %v1197_v25 = vrot.slane %v1195_v30, 5  ;;  %v1182_v12 = vld [vmem:[%s3316_s25 + $0x1c] sm:$0x1]  ;;  %v2820_v17 = vld [vmem:[%s3450_s17 + $0x38] sm:$0xf] }
  0x72   : > { %3002 = vmatprep.mubr.msk.bf16.mxu0 %vm518_vm0, %v3178_v2  ;;  %3007 = vmatpush3.bf16.msra.mxu0 %v3599_v7  ;;  %v1192_v7 = vshrl.u32 %v1175_v11, 16  ;;  %v1203_v39 = vrot.slane %v1201_v31, 5  ;;  %v1209_v41 = vshll.u32 %v1177_v23, 16  ;;  %v1208_v43 = vrot.slane %v1206_v15, 4  ;;  %v2821_v49 = vld [vmem:[%s3450_s17 + $0x3c] sm:$0x1] }
  0x73   : > { %v2305_v38 = vrot.slane %v2304_v28, 4  ;;  %v2296_v2 = vsel %vm3364_vm3, %v2291_v34, %v2295_v37  ;;  %v1215_v46 = vshll.u32 %v1178_v29, 16  ;;  %v2312_v48 = vshrl.u32 %v2816_v32, 16  ;;  %v2822_v40 = vld [vmem:[%s3450_s17 + $0x40] sm:$0xf] }
  0x74   : > { %v1194_v36 = vrot.slane %v1192_v7, 4  ;;  %v1211_v8 = vrot.slane %v1209_v41, 5  ;;  %v2315_v52 = vshll.u32 %v2816_v32, 16  ;;  %v2321_v58 = vshll.u32 %v2817_v42, 16  ;;  %v2823_v34 = vld [vmem:[%s3450_s17 + $0x44] sm:$0x1] }
  0x75   : > { %v2310_v50 = vsel %vm3364_vm3, %v2305_v38, %v2309_v44  ;;  %v1217_v56 = vrot.slane %v1215_v46, 5  ;;  %v2314_v57 = vrot.slane %v2312_v48, 4  ;;  %v2326_v21 = vshrl.u32 %v2818_v47, 16 }
  0x76   : > { %2939 = vmatmul.mubr.msk.bf16.vlgmr.msra.gmra.mrb[0].mxu1 %vm518_vm0, %v3180_v45  ;;  %v1198_v51 = vor.u32 %v1197_v25, %v1194_v36  ;;  %v2825_v55 = vcombine.low %v2296_v2, %v2310_v50  ;;  %v1212_v27 = vor.u32 %v1211_v8, %v1208_v43  ;;  %v2317_v59 = vrot.slane %v2315_v52, 5  ;;  %v1183_v2 = vld [vmem:[%s3316_s25 + $0x20] sm:$0xf]  ;;  %v1184_v43 = vld [vmem:[%s3316_s25 + $0x24] sm:$0x1] }
  0x77   : > { %2947 = vmatpush3.bf16.msra.mxu1 %v3594_v22  ;;  %2942 = vmatprep.mubr.msk.bf16.mxu1 %vm518_vm0, %v3182_v26  ;;  %v2323_v61 = vrot.slane %v2321_v58, 5  ;;  %v2329_v62 = vshll.u32 %v2818_v47, 16  ;;  %v2335_v63 = vshll.u32 %v2819_v9, 16  ;;  %v1220_v1 = vshrl.u32 %v1179_v53, 16  ;;  %v1185_v50 = vld [vmem:[%s3316_s25 + $0x28] sm:$0xf] }
  0x78   : > { %v1199_v22 = vrot.slane %v1198_v51, 4  ;;  %v1213_v5 = vrot.slane %v1212_v27, 4  ;;  %v2318_v6 = vor.u32 %v2317_v59, %v2314_v57  ;;  %v2328_v10 = vrot.slane %v2326_v21, 4  ;;  %v1187_v21 = vld [vmem:[%s3316_s25 + $0x30] sm:$0xf] }
  0x79   : > { %3003 = vmatmul.mubr.msk.bf16.gmra.mrb[4].mxu0 %vm518_vm0, %v3181_v24  ;;  %v2331_v11 = vrot.slane %v2329_v62, 5  ;;  %v2337_v45 = vrot.slane %v2335_v63, 5  ;;  %v1222_v13 = vrot.slane %v1220_v1, 4  ;;  %v1223_v14 = vshll.u32 %v1179_v53, 16 }
  0x7a   : > { %3008 = vmatprep.mubr.msk.bf16.mxu0 %vm518_vm0, %v2824_v33  ;;  %v1204_v3 = vsel %vm3364_vm3, %v1199_v22, %v1203_v39  ;;  %v1218_v16 = vsel %vm3364_vm3, %v1213_v5, %v1217_v56  ;;  %v2319_v18 = vrot.slane %v2318_v6, 4  ;;  %v1229_v19 = vshll.u32 %v1180_v60, 16 }
  0x7b   : > { %v1234_v37 = vshrl.u32 %v1181_v0, 16  ;;  %v2722_v20 = vcombine.low %v1204_v3, %v1218_v16  ;;  %v2332_v23 = vor.u32 %v2331_v11, %v2328_v10  ;;  %v1225_v24 = vrot.slane %v1223_v14, 5  ;;  %v1189_v10 = vld [vmem:[%s3316_s25 + $0x38] sm:$0xf] }
  0x7c   : > { %v1237_v26 = vshll.u32 %v1181_v0, 16  ;;  %v2324_v44 = vsel %vm3364_vm3, %v2319_v18, %v2323_v61  ;;  %v1231_v7 = vrot.slane %v1229_v19, 5  ;;  %v1243_v28 = vshll.u32 %v1182_v12, 16  ;;  %v1188_v0 = vld [vmem:[%s3316_s25 + $0x34] sm:$0x1] }
  0x7d   : > { %v1236_v4 = vrot.slane %v1234_v37, 4  ;;  %v2333_v29 = vrot.slane %v2332_v23, 4  ;;  %v1226_v30 = vor.u32 %v1225_v24, %v1222_v13  ;;  %v2340_v32 = vshrl.u32 %v2820_v17, 16 }
  0x7e   : > { %2943 = vmatmul.mubr.msk.bf16.gmra.mrb[4].mxu1 %vm518_vm0, %v3183_v54  ;;  %v1239_v31 = vrot.slane %v1237_v26, 5  ;;  %v1245_v33 = vrot.slane %v1243_v28, 5  ;;  %v2343_v36 = vshll.u32 %v2820_v17, 16  ;;  %v2349_v15 = vshll.u32 %v2821_v49, 16  ;;  %v1186_v54 = vld [vmem:[%s3316_s25 + $0x2c] sm:$0x1] }
  0x7f   : > { %2948 = vmatprep.mubr.msk.bf16.mxu1 %vm518_vm0, %v2722_v20  ;;  %v2354_v38 = vshrl.u32 %v2822_v40, 16  ;;  %v2338_v25 = vsel %vm3364_vm3, %v2333_v29, %v2337_v45  ;;  %v1227_v39 = vrot.slane %v1226_v30, 4  ;;  %v2342_v42 = vrot.slane %v2340_v32, 4  ;;  %v1190_v17 = vld [vmem:[%s3316_s25 + $0x3c] sm:$0x1]  ;;  %s2650_s25 = sshll.u32 %s3784_s18, 3 }
  0x80   : > { %v1240_v41 = vor.u32 %v1239_v31, %v1236_v4  ;;  %v2826_v46 = vcombine.low %v2324_v44, %v2338_v25  ;;  %v2345_v47 = vrot.slane %v2343_v36, 5  ;;  %v2357_v9 = vshll.u32 %v2822_v40, 16  ;;  %s361_s8 = sadd.s32 %s2651_s10, %s2650_s25 }
  0x81   : > { %3009 = vmatmul.mubr.msk.bf16.vlgmr.msra.gmra.mrb[0].mxu0 %vm518_vm0, %v2825_v55  ;;  %v2356_v48 = vrot.slane %v2354_v38, 4  ;;  %v1232_v51 = vsel %vm3364_vm3, %v1227_v39, %v1231_v7  ;;  %v2363_v52 = vshll.u32 %v2823_v34, 16  ;;  %v1248_v55 = vshrl.u32 %v1183_v2, 16  ;;  %s2652_s15 = sshll.u32 %s361_s8, 3 }
  0x82   : > { %v1241_v8 = vrot.slane %v1240_v41, 4  ;;  %3012 = vmatprep.mubr.msk.bf16.mxu0 %vm518_vm0, %v2826_v46  ;;  %v2346_v53 = vor.u32 %v2345_v47, %v2342_v42  ;;  %v1251_v56 = vshll.u32 %v1183_v2, 16  ;;  %v1257_v57 = vshll.u32 %v1184_v43, 16  ;;  %s3725_s28 = scalar_lea.vmem %s3763_s5, %s2652_s15 }
  0x83   : > { %v2351_v22 = vrot.slane %v2349_v15, 5  ;;  %v2359_v27 = vrot.slane %v2357_v9, 5  ;;  %v1262_v59 = vshrl.u32 %v1185_v50, 16  ;;  %v1250_v62 = vrot.slane %v1248_v55, 4 }
  0x84   : > { %v1246_v58 = vsel %vm3364_vm3, %v1241_v8, %v1245_v33  ;;  %v2347_v61 = vrot.slane %v2346_v53, 4  ;;  %v1253_v63 = vrot.slane %v1251_v56, 5  ;;  %v2365_v3 = vrot.slane %v2363_v52, 5  ;;  %v2833_v8 = vld [vmem:[%s3762_s4] ss:$0 sm:$0xff] }
  0x85   : > { %v2723_v60 = vcombine.low %v1232_v51, %v1246_v58  ;;  %v2360_v1 = vor.u32 %v2359_v27, %v2356_v48  ;;  %v1264_v5 = vrot.slane %v1262_v59, 4  ;;  %v1265_v6 = vshll.u32 %v1185_v50, 16 }
  0x86   : > { %v1254_v11 = vor.u32 %v1253_v63, %v1250_v62  ;;  %v1259_v45 = vrot.slane %v1257_v57, 5  ;;  %v1271_v12 = vshll.u32 %v1186_v54, 16  ;;  %v1276_v13 = vshrl.u32 %v1187_v21, 16 }
  0x87   : > { %2949 = vmatmul.mubr.msk.bf16.vlgmr.msra.gmra.mrb[0].mxu1 %vm518_vm0, %v2723_v60  ;;  %v2352_v14 = vsel %vm3364_vm3, %v2347_v61, %v2351_v22  ;;  %v2361_v16 = vrot.slane %v2360_v1, 4  ;;  %v1267_v18 = vrot.slane %v1265_v6, 5  ;;  %v1279_v19 = vshll.u32 %v1187_v21, 16 }
  0x88   : > { %v1255_v37 = vrot.slane %v1254_v11, 4  ;;  %v1278_v20 = vrot.slane %v1276_v13, 4  ;;  %v1285_v23 = vshll.u32 %v1188_v0, 16  ;;  %v1290_v24 = vshrl.u32 %v1189_v10, 16 }
  0x89   : > { %v2366_v26 = vsel %vm3364_vm3, %v2361_v16, %v2365_v3  ;;  %v1268_v49 = vor.u32 %v1267_v18, %v1264_v5  ;;  %v1273_v40 = vrot.slane %v1271_v12, 5  ;;  %v1281_v44 = vrot.slane %v1279_v19, 5 }
  0x8a   : > { %v2827_v7 = vcombine.low %v2352_v14, %v2366_v26  ;;  %v1292_v4 = vrot.slane %v1290_v24, 4  ;;  %v1293_v28 = vshll.u32 %v1189_v10, 16  ;;  %v1260_v29 = vsel %vm3364_vm3, %v1255_v37, %v1259_v45 }
  0x8b   : > { %v1269_v30 = vrot.slane %v1268_v49, 4  ;;  %v1282_v31 = vor.u32 %v1281_v44, %v1278_v20  ;;  %v1299_v32 = vshll.u32 %v1190_v17, 16  ;;  %v1287_v33 = vrot.slane %v1285_v23, 5 }
  0x8c   : > { %3013 = vmatmul.mubr.msk.bf16.gmra.mrb[4].mxu0 %vm518_vm0, %v2827_v7  ;;  %v1295_v34 = vrot.slane %v1293_v28, 5 }
  0x8d   : > { %v1274_v36 = vsel %vm3364_vm3, %v1269_v30, %v1273_v40  ;;  %v1283_v15 = vrot.slane %v1282_v31, 4  ;;  %v1301_v39 = vrot.slane %v1299_v32, 5 }
  0x8e   : > { %v2724_v38 = vcombine.low %v1260_v29, %v1274_v36  ;;  %v1296_v25 = vor.u32 %v1295_v34, %v1292_v4 }
  0x8f   : > { %v1288_v41 = vsel %vm3364_vm3, %v1283_v15, %v1287_v33 }
  0x90   : > { %2952 = vmatprep.mubr.msk.bf16.mxu1 %vm518_vm0, %v2724_v38  ;;  %v1297_v42 = vrot.slane %v1296_v25, 4 }
  0x92   : > { %v1302_v2 = vsel %vm3364_vm3, %v1297_v42, %v1301_v39 }
  0x93   : > { %v2725_v43 = vcombine.low %v1288_v41, %v1302_v2 }
  0x95   : > { %2953 = vmatmul.mubr.msk.bf16.gmra.mrb[4].mxu1 %vm518_vm0, %v2725_v43 }
 0x154   : > { %v3010_v46 = vpop.f32.mrb[0].mxu0 }
 0x155   : > { %v2433_v47 = vpop.f32.mrb[1].mxu0 }
 0x156   : > { %v3011_v48 = vpop.f32.mrb[2].mxu0 }
 0x157   : > { %v2436_v50 = vpop.f32.mrb[3].mxu0 }
 0x15a   : > { %v2950_v51 = vpop.f32.mrb[0].mxu1 }
 0x15b   : > { %v3016_v35 = vadd.f32 %v3010_v46, %v2950_v51  ;;  %v1369_v9 = vpop.f32.mrb[1].mxu1 }
 0x15c   : > { %v3017_v52 = vadd.f32 %v2433_v47, %v1369_v9  ;;  %v2951_v53 = vpop.f32.mrb[2].mxu1 }
 0x15d   : > { %v2481_v54 = vadd.f32 %v3016_v35, %v2833_v8  ;;  %v3018_v55 = vadd.f32 %v3011_v48, %v2951_v53  ;;  %v1372_v56 = vpop.f32.mrb[3].mxu1 }
 0x15e   : > { %v2479_v57 = vadd.f32 %v3017_v52, %v2833_v8  ;;  %v3019_v58 = vadd.f32 %v2436_v50, %v1372_v56 }
 0x15f   : > { %2490 = vst.msk [vmem:[%s3725_s28 + $0x10] sm:$0xff] %vm2487_vm4, %v2481_v54  ;;  %v2482_v22 = vadd.f32 %v3018_v55, %v2833_v8  ;;  %v3014_v27 = vpop.f32.mrb[4].mxu0 }
 0x160   : > { %2488 = vst.msk [vmem:[%s3725_s28] sm:$0xff] %vm2487_vm4, %v2479_v57  ;;  %v2480_v59 = vadd.f32 %v3019_v58, %v2833_v8  ;;  %v2449_v21 = vpop.f32.mrb[5].mxu0 }
 0x161   : > { %2491 = vst.msk [vmem:[%s3725_s28 + $0x18] sm:$0xff] %vm2487_vm4, %v2482_v22  ;;  %v3015_v60 = vpop.f32.mrb[6].mxu0 }
 0x162   : > { %2489 = vst.msk [vmem:[%s3725_s28 + $0x8] sm:$0xff] %vm2487_vm4, %v2480_v59  ;;  %v2452_v61 = vpop.f32.mrb[7].mxu0 }
 0x168   : > { %v2954_v62 = vpop.f32.mrb[4].mxu1 }
 0x169   : > { %v3020_v63 = vadd.f32 %v3014_v27, %v2954_v62  ;;  %v1385_v0 = vpop.f32.mrb[5].mxu1 }
 0x16a   : > { %v3021_v1 = vadd.f32 %v2449_v21, %v1385_v0  ;;  %v2955_v3 = vpop.f32.mrb[6].mxu1 }
 0x16b   : > { %v2485_v5 = vadd.f32 %v3020_v63, %v2833_v8  ;;  %v3022_v6 = vadd.f32 %v3015_v60, %v2955_v3  ;;  %v1388_v10 = vpop.f32.mrb[7].mxu1 }
 0x16c   : > { %v2483_v11 = vadd.f32 %v3021_v1, %v2833_v8  ;;  %v3023_v45 = vadd.f32 %v2452_v61, %v1388_v10 }
 0x16d   : > { %2494 = vst.msk [vmem:[%s3725_s28 + $0x30] sm:$0xff] %vm2487_vm4, %v2485_v5  ;;  %v2486_v12 = vadd.f32 %v3022_v6, %v2833_v8 }
 0x16e   : > { %2492 = vst.msk [vmem:[%s3725_s28 + $0x20] sm:$0xff] %vm2487_vm4, %v2483_v11  ;;  %v2484_v13 = vadd.f32 %v3023_v45, %v2833_v8 }
 0x16f   : > { %2495 = vst.msk [vmem:[%s3725_s28 + $0x38] sm:$0xff] %vm2487_vm4, %v2486_v12 }
 0x170   : > { %2493 = vst.msk [vmem:[%s3725_s28 + $0x28] sm:$0xff] %vm2487_vm4, %v2484_v13 }
 0x171 PF: > { %s15_s22 = sadd.s32 1, %s3222_s22   ;;  %s3767_s18 = smov %s3214_s20 }
 0x172   : > { %p12_p10 = scmp.ge.s32.totalorder %s15_s22, 10   ;;  %s3768_s19 = smov %s3218_s21 }
 0x173   : > { %s3769_s20 = smov %s3772_s23  ;;  %s3770_s21 = smov %s3776_s24 }
 0x174   :  { %14 = sbr.rel (!%p12_p10) target bundleno = 3 (0x3), region = 79 }

</bundles_post_ra>
